<compile_context>
chip_gen: v5e
topology: v5e:2x2
jax: 0.10.0
libtpu: 0.0.40
codegen_flags: <defaults>
</compile_context>

<pallas_src>
import functools

import jax
import jax.numpy as jnp
from jax import lax
from jax.experimental import pallas as pl
from jax.experimental.pallas import tpu as pltpu

_LANE = 128


def _round_up(a, b):
    return (a + b - 1) // b * b


def _sublane_quantum(dtype):
    """Sublane packing quantum: 8 rows for 4-byte, 16 for 2-byte, 32 for 1-byte."""
    return max(8, 32 // jnp.dtype(dtype).itemsize)


def _vmem_limit_and_block_target():
    """Derive (vmem_limit_bytes, target_block_bytes) from physical VMEM."""
    cap = 64 * 1024 * 1024  # conservative fallback (v7x per-TensorCore VMEM)
    try:
        info = pltpu.get_tpu_info()
        cap = int(getattr(info, "vmem_capacity_bytes", cap)) or cap
    except Exception:
        pass
    vmem_limit = min((cap * 3) // 4, 100 * 1024 * 1024)   # 96 MiB v5e/v6e, 48 MiB v7x
    # Bigger blocks on v7x: higher HBM BW makes the fixed per-step overhead pricier.
    target_block = 6 * 1024 * 1024 if cap < 100 * 1024 * 1024 else 4 * 1024 * 1024
    return vmem_limit, target_block


# ---------------------------------------------------------------------------
# Kernels
# ---------------------------------------------------------------------------
def _maxnorm_fused_kernel(x_ref, o_ref, *, eps):
    """Single pass: whole row resident in the block; reduce + scale in one go."""
    x = x_ref[...]                                                    # (tm, L), native dtype
    m = jnp.max(jnp.abs(x), axis=-1, keepdims=True).astype(jnp.float32)
    scale = pl.reciprocal(jnp.maximum(m, eps), approx=False)          # (tm, 1) f32, exact
    o_ref[...] = (x.astype(jnp.float32) * scale).astype(o_ref.dtype)


def _rowmax_kernel(x_ref, m_ref, *, L, TL):
    """Pass 1 (split-L): accumulate per-row max|x| across column blocks."""
    k = pl.program_id(1)
    a = jnp.abs(x_ref[...])                                           # (TM, TL)
    if L % TL != 0:
        # Mask OOB lanes of the partial tail column block.  Uniform expression:
        # for full blocks `remaining >= TL`, so nothing is masked there.
        remaining = L - k * TL
        lane = lax.broadcasted_iota(jnp.int32, a.shape, 1)
        a = jnp.where(lane < remaining, a, jnp.zeros_like(a))
    part = jnp.max(a, axis=-1, keepdims=True).astype(jnp.float32)

    @pl.when(k == 0)
    def _():
        m_ref[...] = part

    @pl.when(k != 0)
    def _():
        m_ref[...] = jnp.maximum(m_ref[...], part)


def _scale_kernel(x_ref, m_ref, o_ref, *, eps):
    """Pass 2 (split-L): x * 1/max(m, eps); fully parallel grid."""
    scale = pl.reciprocal(jnp.maximum(m_ref[...], eps), approx=False)  # (TM, 1) f32
    o_ref[...] = (x_ref[...].astype(jnp.float32) * scale).astype(o_ref.dtype)


# ---------------------------------------------------------------------------
# Wrapper
# ---------------------------------------------------------------------------
def max_norm(x, per_channel=True, eps=1e-8, *, donate_input=False,
             force_two_pass=False, col_block_elems=None):
    """Pallas implementation of MaxNorm.forward for a 5D tensor (bs, c, d, h, w)."""
    assert x.ndim == 5, f"input should be a 5D tensor, got {x.ndim}D"
    bs, c, d, h, w = x.shape

    if per_channel:
        N, L = bs * c, d * h * w
    else:
        N, L = bs, c * d * h * w
    x2 = x.reshape(N, L)

    itemsize = jnp.dtype(x.dtype).itemsize
    sub_q = _sublane_quantum(x.dtype)
    vmem_limit, target_block = _vmem_limit_and_block_target()

    lp128 = _round_up(L, _LANE)                 # physical lane footprint of one row
    row_bytes = lp128 * itemsize
    # Budget per block buffer: input + output double-buffered plus f32 temporaries
    # for the scale multiply -> keep each block <= ~1/8 of the scoped VMEM limit.
    block_budget = vmem_limit // 8

    io_alias = {0: 0} if donate_input else {}
    fused = (sub_q * row_bytes <= block_budget) and not force_two_pass

    if fused:
        # ---- Single pass: each block holds tm full rows (last dim == full L). ----
        if N <= sub_q:
            tm = N                               # block dim == full array dim (exempt)
        else:
            tm = max(sub_q, (target_block // row_bytes) // sub_q * sub_q)
            tm = min(tm, max(sub_q, (block_budget // row_bytes) // sub_q * sub_q))
            # keep >= 2 grid steps so DMA pipelining / megacore sharding engage
            tm = min(tm, _round_up(pl.cdiv(N, 2), sub_q))
        grid_rows = pl.cdiv(N, tm)

        out2 = pl.pallas_call(
            functools.partial(_maxnorm_fused_kernel, eps=eps),
            out_shape=jax.ShapeDtypeStruct((N, L), x.dtype),
            grid_spec=pltpu.PrefetchScalarGridSpec(
                num_scalar_prefetch=0,
                grid=(grid_rows,),
                in_specs=[pl.BlockSpec((tm, L), lambda i: (i, 0))],
                out_specs=pl.BlockSpec((tm, L), lambda i: (i, 0)),
            ),
            compiler_params=pltpu.CompilerParams(
                dimension_semantics=("parallel",),
                vmem_limit_bytes=vmem_limit),
            input_output_aliases=io_alias,
        )(x2)
    else:
        # ---- Two-pass split-L path for rows too large to keep resident. ----
        TM = sub_q if N >= sub_q else N
        if col_block_elems is not None:
            TL = _round_up(col_block_elems, _LANE)
        else:
            TL = max(_LANE, (target_block // (TM * itemsize)) // _LANE * _LANE)
        TL = min(TL, lp128)
        grid = (pl.cdiv(N, TM), pl.cdiv(L, TL))

        # Pass 1: per-row max|x|; reduction axis last; resident accumulator block.
        # NOTE: on v7x with tiny N this runs on one TensorCore; a size-2 parallel
        # L-half axis (partial maxes combined in pass 2) would use both cores.
        m = pl.pallas_call(
            functools.partial(_rowmax_kernel, L=L, TL=TL),
            out_shape=jax.ShapeDtypeStruct((N, 1), jnp.float32),
            grid_spec=pltpu.PrefetchScalarGridSpec(
                num_scalar_prefetch=0,
                grid=grid,
                in_specs=[pl.BlockSpec((TM, TL), lambda i, k: (i, k))],
                out_specs=pl.BlockSpec((TM, 1), lambda i, k: (i, 0)),
            ),
            compiler_params=pltpu.CompilerParams(
                dimension_semantics=("parallel", "arbitrary"),
                vmem_limit_bytes=vmem_limit),
        )(x2)

        # Pass 2: scale, fully parallel grid.
        out2 = pl.pallas_call(
            functools.partial(_scale_kernel, eps=eps),
            out_shape=jax.ShapeDtypeStruct((N, L), x.dtype),
            grid_spec=pltpu.PrefetchScalarGridSpec(
                num_scalar_prefetch=0,
                grid=grid,
                in_specs=[pl.BlockSpec((TM, TL), lambda i, k: (i, k)),
                          pl.BlockSpec((TM, 1), lambda i, k: (i, 0))],
                out_specs=pl.BlockSpec((TM, TL), lambda i, k: (i, k)),
            ),
            compiler_params=pltpu.CompilerParams(
                dimension_semantics=("parallel", "parallel"),
                vmem_limit_bytes=vmem_limit),
            input_output_aliases=io_alias,
        )(x2, m)

    return out2.reshape(bs, c, d, h, w)


def _max_norm_ref(x, per_channel=True, eps=1e-8):
    """Pure-JAX reference mirroring torch.nn.functional.normalize(p=inf)."""
    axes = (-3, -2, -1) if per_channel else (-4, -3, -2, -1)
    m = jnp.max(jnp.abs(x), axis=axes, keepdims=True)
    return x / jnp.maximum(m, eps)


if __name__ == "__main__":
    key = jax.random.PRNGKey(0)
    bs, c, d, h, w = 2, 4, 4, 7, 10         # L deliberately not a multiple of 128
    x = jax.random.normal(key, (bs, c, d, h, w), dtype=jnp.float32)

    # per_channel=True (module default): fused single-pass path, full-L blocks.
    out = jax.block_until_ready(max_norm(x, per_channel=True, eps=1e-8))
    ref = _max_norm_ref(x, per_channel=True, eps=1e-8)
    assert out.shape == x.shape and out.dtype == x.dtype
    assert float(jnp.max(jnp.abs(out - ref))) < 1e-6

    # per_channel=False: fused path with block rows == N (< sublane quantum).
    out2 = jax.block_until_ready(max_norm(x, per_channel=False, eps=1e-8))
    ref2 = _max_norm_ref(x, per_channel=False, eps=1e-8)
    assert float(jnp.max(jnp.abs(out2 - ref2))) < 1e-6

    # Fused path with a partial last row block (N = 15, not a multiple of 8).
    x3 = jax.random.normal(jax.random.PRNGKey(1), (3, 5, 2, 7, 10), jnp.float32)
    out3 = jax.block_until_ready(max_norm(x3, per_channel=True, eps=1e-8))
    ref3 = _max_norm_ref(x3, per_channel=True, eps=1e-8)
    assert float(jnp.max(jnp.abs(out3 - ref3))) < 1e-6

    # Force the two-pass split-L path with a small column tile so the masked
    # (partial) tail column block in the reduction kernel is exercised too.
    out4 = jax.block_until_ready(
        max_norm(x, per_channel=False, eps=1e-8,
                 force_two_pass=True, col_block_elems=128))
    assert float(jnp.max(jnp.abs(out4 - ref2))) < 1e-6

    print("KERNEL_OK")
</pallas_src>

<mosaic_0001>
module attributes {stable_mosaic.version = 11 : i64} {
  func.func @_maxnorm_fused_kernel(%arg0: i32, %arg1: memref<8x280xf32, #tpu.memory_space<vmem>>, %arg2: memref<8x280xf32, #tpu.memory_space<vmem>>) attributes {dimension_semantics = [#tpu.dimension_semantics<parallel>], iteration_bounds = array<i64: 1>, scalar_prefetch = 0 : i64, scratch_operands = 0 : i64, tpu.core_type = #tpu.core_type<tc>, window_params = [{transform_indices = @transform_0, window_bounds = array<i64: 8, 280>}, {transform_indices = @transform_1, window_bounds = array<i64: 8, 280>}]} {
    %c0 = arith.constant 0 : index
    %c0_0 = arith.constant 0 : index
    %0 = vector.load %arg1[%c0, %c0_0] : memref<8x280xf32, #tpu.memory_space<vmem>>, vector<8x280xf32>
    %1 = math.absf %0 : vector<8x280xf32>
    %cst = arith.constant dense<0xFF800000> : vector<8xf32>
    %2 = vector.multi_reduction <maximumf>, %1, %cst [1] : vector<8x280xf32> to vector<8xf32>
    %3 = vector.shape_cast %2 : vector<8xf32> to vector<8x1xf32>
    %cst_1 = arith.constant 9.99999993E-9 : f32
    %4 = vector.broadcast %cst_1 : f32 to vector<8x1xf32>
    %5 = arith.maximumf %3, %4 : vector<8x1xf32>
    %6 = tpu.reciprocal %5 : vector<8x1xf32> -> vector<8x1xf32>
    %7 = vector.broadcast %6 : vector<8x1xf32> to vector<8x280xf32>
    %8 = arith.mulf %0, %7 : vector<8x280xf32>
    %c0_2 = arith.constant 0 : index
    %c0_3 = arith.constant 0 : index
    %9 = vector.load %arg2[%c0_2, %c0_3] : memref<8x280xf32, #tpu.memory_space<vmem>>, vector<8x280xf32>
    tpu.vector_store %arg2[%c0_2, %c0_3], %8 {strides = array<i32>} : memref<8x280xf32, #tpu.memory_space<vmem>>, vector<8x280xf32>,
    return
  }
  func.func @transform_0(%arg0: i32) -> (i32, i32) {
    %c0_i32 = arith.constant 0 : i32
    %c0_i32_0 = arith.constant 0 : i32
    return %arg0, %c0_i32 : i32, i32
  }
  func.func @transform_1(%arg0: i32) -> (i32, i32) {
    %c0_i32 = arith.constant 0 : i32
    %c0_i32_0 = arith.constant 0 : i32
    return %arg0, %c0_i32 : i32, i32
  }
}

</mosaic_0001>

<bundles_post_ra>
// kernel: tpu_custom_call.1
= control target key start
LH: loop header
LB: loop body
LE: loop exit
PB: predicated region body
PF: predicated region fallthrough
CT: control target
= control target key end

     0   :  { %6 = vsyncpa [#allocation3], 0  ;;  %s149_s0 = inlined_call_operand.hbm [shape: f32[8,280], index: 0, kind: input, shape index: {}]   ;;  %s150_s1 = inlined_call_operand.hbm [shape: f32[8,280], index: 1, kind: output, shape index: {}]  }
   0x1   :  { %7 = vsyncpa [#allocation4], 0  ;;  %s13_s8 = sshll.u32 %s149_s0, 4  ;;  %s129_s9 = smov [#allocation2]   ;;  %s14_s8 = int_to_ptr.hbm [resolvable:$true] %s13_s8 }
   0x2   :  { %s15_s10 = sshll.u32 %s129_s9, 4  ;;  %s16_s10 = int_to_ptr.vmem [resolvable:$true] %s15_s10 }
   0x3   :  { %18 = dma.hbm_to_vmem [thread:$0]  %s14_s8, 384, %s16_s10, [#allocation3]  }
   0x4   :  { %125 = dma.done.wait [#allocation3], 384  }
   0x5   :  { %126 = vsyncadd [#allocation3], 4294966912  ;;  %v23_v0 = vld [vmem:[#allocation2] sm:$0xff]  ;;  %v24_v1 = vld [vmem:[#allocation2 + $0x8] sm:$0xff]  ;;  %vm29_vm0 = vcmask 195584   ;;  %s130_s0 = smov [#allocation5]  }
   0x6   :  { %v25_v2 = vld [vmem:[#allocation2 + $0x10] sm:$0xff]  ;;  %v26_v3 = vand.u32 2147483647, %v23_v0  ;;  %v27_v4 = vand.u32 2147483647, %v24_v1  ;;  %s61_s11 = sshll.u32 %s130_s0, 4  ;;  %s62_s11 = int_to_ptr.vmem [resolvable:$true] %s61_s11 }
   0x7   :  { %v28_v5 = vand.u32 2147483647, %v25_v2  ;;  %s63_s14 = sshll.u32 %s150_s1, 4  ;;  %s64_s14 = int_to_ptr.hbm [resolvable:$true] %s63_s14 }
   0x8   :  { %v31_v7 = vmax.f32 %v26_v3, %v27_v4 }
   0x9   :  { %v30_v6 = vsel %vm29_vm0, %v28_v5, -inf }
   0xa   :  { %v32_v8 = vmax.f32 %v31_v7, %v30_v6 }
   0xc   :  { %33 = vmax.xlane.f32.xlu0 %v32_v8 }
  0x7f   :  { %v34_v9 = vpop.xlane.xlu0 %33 }
  0x80   :  { %v35_v10 = vmax.f32 %v34_v9, 1e-08 }
  0x82   :  { %75 = vrcp.f32 %v35_v10  ;;  %v47_v14 = vand.u32 2147483648, %v35_v10  ;;  %v45_v16 = vand.u32 2147483647, %v35_v10  ;;  %vm41_vm2 = vweird.f32 %v35_v10 }
  0x84   :  { %v48_v18 = vor.u32 1.1754944e-38, %v47_v14  ;;  %vm46_vm4 = vcmp.eq.f32.partialorder %v45_v16, 8.507059e+37 }
  0x88   :  { %v76_v11 = vpop.eup %75 }
  0x89   :  { %v37_v12 = vmul.f32 %v76_v11, %v35_v10  ;;  %vm42_vm1 = vweird.f32 %v76_v11 }
  0x8a   :  { %vm43_vm3 = vmor %vm41_vm2, %vm42_vm1 }
  0x8b   :  { %v38_v13 = vsub.f32 1.0, %v37_v12 }
  0x8d   :  { %v39_v15 = vmul.f32 %v76_v11, %v38_v13 }
  0x8f   :  { %v40_v17 = vadd.f32 %v76_v11, %v39_v15 }
  0x91   :  { %v44_v19 = vsel %vm43_vm3, %v76_v11, %v40_v17 }
  0x92   :  { %v49_v20 = vsel %vm46_vm4, %v48_v18, %v44_v19 }
  0x93   :  { %v50_v21 = vmul.f32 %v49_v20, %v23_v0  ;;  %v51_v22 = vmul.f32 %v49_v20, %v24_v1  ;;  %v52_v23 = vmul.f32 %v49_v20, %v25_v2 }
  0x95   :  { %53 = vst [vmem:[#allocation5] sm:$0xff] %v50_v21 }
  0x96   :  { %54 = vst [vmem:[#allocation5 + $0x8] sm:$0xff] %v51_v22 }
  0x97   :  { %55 = vst.msk [vmem:[#allocation5 + $0x10] sm:$0xff] %vm29_vm0, %v52_v23 }
  0x98   :  { %66 = dma.vmem_to_hbm [thread:$0]  %s62_s11, 384, %s64_s14, [#allocation4]  }
  0x99   :  { %127 = dma.done.wait [#allocation4], 384  }
  0x9a   :  { %128 = vsyncadd [#allocation4], 4294966912 }
  0x9b   :  { %71 = vsyncpa [#allocation3], 1 }
  0x9c   :  { %72 = vsyncpa [#allocation4], 1 }

</bundles_post_ra>
